<compile_context>
chip_gen: v5e
topology: v5e:2x2
jax: 0.10.0
libtpu: 0.0.40
codegen_flags: <defaults>
</compile_context>

<pallas_src>
import jax
import jax.numpy as jnp
from jax.experimental import pallas as pl
from jax.experimental.pallas import tpu as pltpu


def _round_up(x: int, m: int) -> int:
    return ((x + m - 1) // m) * m


# ----------------------------- Pallas kernel ------------------------------- #
# Refs (per grid step over batch tiles of size bt):
#   x_ref   : (bt, state_dim)   f32, natural layout, contiguous row DMA
#   wN_ref  : (in, out)         pre-transposed weights, compute dtype
#   bN_ref  : (1, out)          f32, broadcasts over the batch (sublane) axis
#   out_ref : (bt, action_dim)  f32
def actor_kernel(x_ref, w1_ref, b1_ref, w2_ref, b2_ref, w3_ref, b3_ref, out_ref):
    cdt = w1_ref.dtype                      # matmul operand dtype (f32 or bf16)
    x = x_ref[...].astype(cdt)              # (bt, S); cast is a no-op for f32

    # layer 1 (state normalization already folded into w1/b1): Linear + ReLU
    h1 = jnp.dot(x, w1_ref[...], preferred_element_type=jnp.float32) + b1_ref[...]
    h1 = jnp.maximum(h1, 0.0)

    # layer 2: Linear + ReLU
    h2 = jnp.dot(h1.astype(cdt), w2_ref[...],
                 preferred_element_type=jnp.float32) + b2_ref[...]
    h2 = jnp.maximum(h2, 0.0)

    # output layer: Linear + tanh (epilogue stays f32)
    a = jnp.dot(h2.astype(cdt), w3_ref[...],
                preferred_element_type=jnp.float32) + b3_ref[...]
    out_ref[...] = jnp.tanh(a).astype(out_ref.dtype)


# --------------------------- parameter preparation -------------------------- #
def prepare_actor_params(params, *, compute_dtype=jnp.float32):
    """Fold state normalization into the first Linear and pre-transpose weights
    to (in, out) layout.  MUST be re-run whenever state_avg / state_std change
    (they are running statistics updated during TD3 training)."""
    avg, std, w1, b1, w2, b2, w3, b3 = params
    std = jnp.maximum(std, 1e-8)            # guard against degenerate running std
    w1f = w1 / std[None, :]                 # (H1, S): scale input features
    b1f = b1 - w1f @ avg                    # absorb the mean shift

    w1t = w1f.T.astype(compute_dtype)       # (S,  H1)
    w2t = w2.T.astype(compute_dtype)        # (H1, H2)
    w3t = w3.T.astype(compute_dtype)        # (H2, A)
    b1r = b1f.reshape(1, -1).astype(jnp.float32)
    b2r = b2.reshape(1, -1).astype(jnp.float32)
    b3r = b3.reshape(1, -1).astype(jnp.float32)
    return (w1t, b1r, w2t, b2r, w3t, b3r)


# ------------------------------ host wrapper -------------------------------- #
def actor_forward(state, prepared, *, batch_tile=4096):
    """state: (batch, state_dim) f32; prepared: output of prepare_actor_params.
    Returns actions of shape (batch, action_dim), f32."""
    w1t, b1r, w2t, b2r, w3t, b3r = prepared
    batch, state_dim = state.shape
    action_dim = w3t.shape[1]

    # Batch tile: multiple of 128, capped so the grid has >= 4 steps when the
    # batch is large enough (keeps both v7x TensorCores busy); tiny batches use
    # a single full-array block.
    if batch <= 256:
        bt = batch
    else:
        bt = max(128, min(batch_tile, _round_up(pl.cdiv(batch, 4), 128)))
    grid = (pl.cdiv(batch, bt),)            # ragged last block handled by Pallas

    def resident(shape):                    # same block every step -> VMEM-resident
        return pl.BlockSpec(shape, lambda i: (0, 0))

    return pl.pallas_call(
        actor_kernel,
        out_shape=jax.ShapeDtypeStruct((batch, action_dim), jnp.float32),
        grid=grid,
        in_specs=[
            pl.BlockSpec((bt, state_dim), lambda i: (i, 0)),  # contiguous row DMA
            resident(w1t.shape), resident(b1r.shape),
            resident(w2t.shape), resident(b2r.shape),
            resident(w3t.shape), resident(b3r.shape),
        ],
        out_specs=pl.BlockSpec((bt, action_dim), lambda i: (i, 0)),
        compiler_params=pltpu.CompilerParams(
            # batch tiles are independent -> shard across TensorCores (v7x).
            dimension_semantics=("parallel",),
            # NOTE: at bt <= 4096 per-tile VMEM (I/O + f32 intermediates) is a
            # few MiB, far under the 16/32 MiB scoped defaults; raise
            # vmem_limit_bytes only if batch_tile is pushed toward 16K+.
        ),
    )(state, w1t, b1r, w2t, b2r, w3t, b3r)


# ------------------------- deterministic parameters ------------------------ #
def init_actor_params(key, state_dim, dims, action_dim, *, nontrivial_stats=True):
    """Mirror Actor.__init__: default nn.Linear init for hidden layers,
    orthogonal(std=0.5) + bias=1e-6 for the output layer.  Weights are in
    native PyTorch (out, in) layout, biases as (out,)."""
    sizes = [state_dim, *dims, action_dim]
    k_avg, k_std, k1, k2, k3 = jax.random.split(key, 5)

    # state_avg / state_std buffers are zeros/ones in __init__; use non-trivial
    # values here so the normalization-folding path is actually exercised.
    if nontrivial_stats:
        avg = 0.3 * jax.random.normal(k_avg, (state_dim,), jnp.float32)
        std = jax.random.uniform(k_std, (state_dim,), jnp.float32, 0.5, 1.5)
    else:
        avg = jnp.zeros((state_dim,), jnp.float32)
        std = jnp.ones((state_dim,), jnp.float32)

    def linear_default(k, fan_in, fan_out):
        kw, kb = jax.random.split(k)
        bound = 1.0 / jnp.sqrt(jnp.float32(fan_in))
        w = jax.random.uniform(kw, (fan_out, fan_in), jnp.float32, -bound, bound)
        b = jax.random.uniform(kb, (fan_out,), jnp.float32, -bound, bound)
        return w, b

    w1, b1 = linear_default(k1, sizes[0], sizes[1])
    w2, b2 = linear_default(k2, sizes[1], sizes[2])

    # output layer: orthogonal init with gain 0.5 on the (out, in) weight
    ortho = jax.nn.initializers.orthogonal(scale=0.5)
    w3 = ortho(k3, (sizes[3], sizes[2]), jnp.float32)
    b3 = jnp.full((sizes[3],), 1e-6, jnp.float32)

    return (avg, std, w1, b1, w2, b2, w3, b3)


# ---------------------------- pure-JAX reference ---------------------------- #
def actor_forward_ref(state, params):
    avg, std, w1, b1, w2, b2, w3, b3 = params
    x = (state - avg) / std
    h = jnp.maximum(x @ w1.T + b1, 0.0)
    h = jnp.maximum(h @ w2.T + b2, 0.0)
    return jnp.tanh(h @ w3.T + b3)


if __name__ == "__main__":
    state_dim = 16
    dims = (32, 32)
    action_dim = 8

    key = jax.random.PRNGKey(0)
    k_params, k_s1, k_s2 = jax.random.split(key, 3)
    params = init_actor_params(k_params, state_dim, dims, action_dim)

    # --- small batch, f32, single full-array block: strict numerical check ---
    prepared_f32 = prepare_actor_params(params)
    state = jax.random.normal(k_s1, (8, state_dim), jnp.float32)
    out = jax.block_until_ready(actor_forward(state, prepared_f32))
    ref = actor_forward_ref(state, params)
    assert out.shape == (8, action_dim)
    assert jnp.allclose(out, ref, atol=1e-5, rtol=1e-5), "f32 small-batch mismatch"

    # --- larger non-multiple batch, f32, tiled parallel grid (ragged last tile)
    state_big = jax.random.normal(k_s2, (1000, state_dim), jnp.float32)
    out_big = jax.block_until_ready(actor_forward(state_big, prepared_f32))
    ref_big = actor_forward_ref(state_big, params)
    assert out_big.shape == (1000, action_dim)
    assert jnp.allclose(out_big, ref_big, atol=1e-4, rtol=1e-4), "f32 big-batch mismatch"

    # --- bf16 matmul operands: weights cast host-side (tiny, one-time),
    #     activations cast in-kernel; no extra host pass over the states.
    prepared_bf16 = prepare_actor_params(params, compute_dtype=jnp.bfloat16)
    out_bf16 = jax.block_until_ready(
        actor_forward(state_big, prepared_bf16, batch_tile=256))
    assert out_bf16.shape == (1000, action_dim)
    assert jnp.allclose(out_bf16, ref_big, atol=3e-2, rtol=3e-2), "bf16 mismatch"

    # TODO(synk): get_action()'s Normal-sampled exploration noise is not part of
    # forward() and is left to the host (jax.random) if needed.
    print("KERNEL_OK")
</pallas_src>

<mosaic_0001>
module attributes {stable_mosaic.version = 11 : i64} {
  func.func @actor_kernel(%arg0: i32, %arg1: memref<8x16xf32, #tpu.memory_space<vmem>>, %arg2: memref<16x32xf32, #tpu.memory_space<vmem>>, %arg3: memref<1x32xf32, #tpu.memory_space<vmem>>, %arg4: memref<32x32xf32, #tpu.memory_space<vmem>>, %arg5: memref<1x32xf32, #tpu.memory_space<vmem>>, %arg6: memref<32x8xf32, #tpu.memory_space<vmem>>, %arg7: memref<1x8xf32, #tpu.memory_space<vmem>>, %arg8: memref<8x8xf32, #tpu.memory_space<vmem>>) attributes {dimension_semantics = [#tpu.dimension_semantics<parallel>], iteration_bounds = array<i64: 1>, scalar_prefetch = 0 : i64, scratch_operands = 0 : i64, tpu.core_type = #tpu.core_type<tc>, window_params = [{transform_indices = @transform_0, window_bounds = array<i64: 8, 16>}, {pipeline_mode = #tpu.pipeline_mode<synchronous>, transform_indices = @transform_1, window_bounds = array<i64: 16, 32>}, {pipeline_mode = #tpu.pipeline_mode<synchronous>, transform_indices = @transform_2, window_bounds = array<i64: 1, 32>}, {pipeline_mode = #tpu.pipeline_mode<synchronous>, transform_indices = @transform_3, window_bounds = array<i64: 32, 32>}, {pipeline_mode = #tpu.pipeline_mode<synchronous>, transform_indices = @transform_4, window_bounds = array<i64: 1, 32>}, {pipeline_mode = #tpu.pipeline_mode<synchronous>, transform_indices = @transform_5, window_bounds = array<i64: 32, 8>}, {pipeline_mode = #tpu.pipeline_mode<synchronous>, transform_indices = @transform_6, window_bounds = array<i64: 1, 8>}, {transform_indices = @transform_7, window_bounds = array<i64: 8, 8>}]} {
    %c0 = arith.constant 0 : index
    %c0_0 = arith.constant 0 : index
    %0 = vector.load %arg1[%c0, %c0_0] : memref<8x16xf32, #tpu.memory_space<vmem>>, vector<8x16xf32>
    %c0_1 = arith.constant 0 : index
    %c0_2 = arith.constant 0 : index
    %1 = vector.load %arg2[%c0_1, %c0_2] : memref<16x32xf32, #tpu.memory_space<vmem>>, vector<16x32xf32>
    %cst = arith.constant dense<0.000000e+00> : vector<8x32xf32>
    %2 = tpu.matmul %0, %1, %cst {dimension_numbers = #tpu.dot_dimension_numbers<[1], [0], [0], [1], [0, 0, 1, 1], [], []>} : vector<8x16xf32>, vector<16x32xf32>, vector<8x32xf32> -> vector<8x32xf32>
    %c0_3 = arith.constant 0 : index
    %c0_4 = arith.constant 0 : index
    %3 = vector.load %arg3[%c0_3, %c0_4] : memref<1x32xf32, #tpu.memory_space<vmem>>, vector<1x32xf32>
    %4 = vector.broadcast %3 : vector<1x32xf32> to vector<8x32xf32>
    %5 = arith.addf %2, %4 : vector<8x32xf32>
    %cst_5 = arith.constant 0.000000e+00 : f32
    %6 = vector.broadcast %cst_5 : f32 to vector<8x32xf32>
    %7 = arith.maximumf %5, %6 : vector<8x32xf32>
    %c0_6 = arith.constant 0 : index
    %c0_7 = arith.constant 0 : index
    %8 = vector.load %arg4[%c0_6, %c0_7] : memref<32x32xf32, #tpu.memory_space<vmem>>, vector<32x32xf32>
    %cst_8 = arith.constant dense<0.000000e+00> : vector<8x32xf32>
    %9 = tpu.matmul %7, %8, %cst_8 {dimension_numbers = #tpu.dot_dimension_numbers<[1], [0], [0], [1], [0, 0, 1, 1], [], []>} : vector<8x32xf32>, vector<32x32xf32>, vector<8x32xf32> -> vector<8x32xf32>
    %c0_9 = arith.constant 0 : index
    %c0_10 = arith.constant 0 : index
    %10 = vector.load %arg5[%c0_9, %c0_10] : memref<1x32xf32, #tpu.memory_space<vmem>>, vector<1x32xf32>
    %11 = vector.broadcast %10 : vector<1x32xf32> to vector<8x32xf32>
    %12 = arith.addf %9, %11 : vector<8x32xf32>
    %cst_11 = arith.constant 0.000000e+00 : f32
    %13 = vector.broadcast %cst_11 : f32 to vector<8x32xf32>
    %14 = arith.maximumf %12, %13 : vector<8x32xf32>
    %c0_12 = arith.constant 0 : index
    %c0_13 = arith.constant 0 : index
    %15 = vector.load %arg6[%c0_12, %c0_13] : memref<32x8xf32, #tpu.memory_space<vmem>>, vector<32x8xf32>
    %cst_14 = arith.constant dense<0.000000e+00> : vector<8x8xf32>
    %16 = tpu.matmul %14, %15, %cst_14 {dimension_numbers = #tpu.dot_dimension_numbers<[1], [0], [0], [1], [0, 0, 1, 1], [], []>} : vector<8x32xf32>, vector<32x8xf32>, vector<8x8xf32> -> vector<8x8xf32>
    %c0_15 = arith.constant 0 : index
    %c0_16 = arith.constant 0 : index
    %17 = vector.load %arg7[%c0_15, %c0_16] : memref<1x8xf32, #tpu.memory_space<vmem>>, vector<1x8xf32>
    %18 = vector.broadcast %17 : vector<1x8xf32> to vector<8x8xf32>
    %19 = arith.addf %16, %18 : vector<8x8xf32>
    %20 = math.tanh %19 : vector<8x8xf32>
    %c0_17 = arith.constant 0 : index
    %c0_18 = arith.constant 0 : index
    %21 = vector.load %arg8[%c0_17, %c0_18] : memref<8x8xf32, #tpu.memory_space<vmem>>, vector<8x8xf32>
    tpu.vector_store %arg8[%c0_17, %c0_18], %20 {strides = array<i32>} : memref<8x8xf32, #tpu.memory_space<vmem>>, vector<8x8xf32>,
    return
  }
  func.func @transform_0(%arg0: i32) -> (i32, i32) {
    %c0_i32 = arith.constant 0 : i32
    %c0_i32_0 = arith.constant 0 : i32
    return %arg0, %c0_i32 : i32, i32
  }
  func.func @transform_1(%arg0: i32) -> (i32, i32) {
    %c0_i32 = arith.constant 0 : i32
    %c0_i32_0 = arith.constant 0 : i32
    %c0_i32_1 = arith.constant 0 : i32
    return %c0_i32, %c0_i32_0 : i32, i32
  }
  func.func @transform_2(%arg0: i32) -> (i32, i32) {
    %c0_i32 = arith.constant 0 : i32
    %c0_i32_0 = arith.constant 0 : i32
    %c0_i32_1 = arith.constant 0 : i32
    return %c0_i32, %c0_i32_0 : i32, i32
  }
  func.func @transform_3(%arg0: i32) -> (i32, i32) {
    %c0_i32 = arith.constant 0 : i32
    %c0_i32_0 = arith.constant 0 : i32
    %c0_i32_1 = arith.constant 0 : i32
    return %c0_i32, %c0_i32_0 : i32, i32
  }
  func.func @transform_4(%arg0: i32) -> (i32, i32) {
    %c0_i32 = arith.constant 0 : i32
    %c0_i32_0 = arith.constant 0 : i32
    %c0_i32_1 = arith.constant 0 : i32
    return %c0_i32, %c0_i32_0 : i32, i32
  }
  func.func @transform_5(%arg0: i32) -> (i32, i32) {
    %c0_i32 = arith.constant 0 : i32
    %c0_i32_0 = arith.constant 0 : i32
    %c0_i32_1 = arith.constant 0 : i32
    return %c0_i32, %c0_i32_0 : i32, i32
  }
  func.func @transform_6(%arg0: i32) -> (i32, i32) {
    %c0_i32 = arith.constant 0 : i32
    %c0_i32_0 = arith.constant 0 : i32
    %c0_i32_1 = arith.constant 0 : i32
    return %c0_i32, %c0_i32_0 : i32, i32
  }
  func.func @transform_7(%arg0: i32) -> (i32, i32) {
    %c0_i32 = arith.constant 0 : i32
    %c0_i32_0 = arith.constant 0 : i32
    return %arg0, %c0_i32 : i32, i32
  }
}

</mosaic_0001>

<bundles_post_ra>
// kernel: tpu_custom_call.1
= control target key start
LH: loop header
LB: loop body
LE: loop exit
PB: predicated region body
PF: predicated region fallthrough
CT: control target
= control target key end

     0   :  { %12 = vsyncpa [#allocation3], 0  ;;  %s309_s0 = inlined_call_operand.vmem [shape: f32[8,16], index: 0, kind: input, shape index: {}]   ;;  %s310_s1 = inlined_call_operand.hbm [shape: f32[16,32], index: 1, kind: input, shape index: {}]   ;;  %s311_s2 = inlined_call_operand.vmem [shape: f32[1,32], index: 2, kind: input, shape index: {}]   ;;  %s312_s3 = inlined_call_operand.vmem [shape: f32[32,32], index: 3, kind: input, shape index: {}]   ;;  %s313_s4 = inlined_call_operand.vmem [shape: f32[1,32], index: 4, kind: input, shape index: {}]   ;;  %s314_s5 = inlined_call_operand.vmem [shape: f32[32,8], index: 5, kind: input, shape index: {}]   ;;  %s315_s6 = inlined_call_operand.vmem [shape: f32[1,8], index: 6, kind: input, shape index: {}]   ;;  %s316_s7 = inlined_call_operand.hbm [shape: f32[8,8], index: 7, kind: output, shape index: {}]  }
   0x1   :  { %13 = vsyncpa [#allocation4], 0  ;;  %s20_s26 = sshll.u32 %s310_s1, 4  ;;  %s223_s27 = smov [#allocation2]   ;;  %s21_s26 = int_to_ptr.hbm [resolvable:$true] %s20_s26 }
   0x2   :  { %s22_s28 = sshll.u32 %s223_s27, 4  ;;  %s224_s29 = smov 128   ;;  %s23_s28 = int_to_ptr.vmem [resolvable:$true] %s22_s28 }
   0x3   :  { %s225_s30 = smov 8  }
   0x4   :  { %28 = dma.hbm_to_vmem [thread:$0]  %s21_s26, 256, %s23_s28, [#allocation3], %s224_s29, %s224_s29, %s225_s30  }
   0x5   :  { %219 = dma.done.wait [#allocation3], 256  }
   0x6   :  { %220 = vsyncadd [#allocation3], 4294967040  ;;  %v45_v0 = vld [vmem:[#allocation2 + $0x8] sm:$0xff]  ;;  %v44_v1 = vld [vmem:[#allocation2] sm:$0xff]  ;;  %vm50_vm0 = vcmask 130048   ;;  %vm83_vm1 = vcmask 261120  }
   0x7   :  { %68 = vmatpush.msra.mxu0 %v45_v0  ;;  %v43_v2 = vld [vmem:[%s309_s0] sm:$0xff]  ;;  %v78_v3 = vld [vmem:[%s312_s3 + $0x18] sm:$0xff]  ;;  %v77_v4 = vld [vmem:[%s312_s3 + $0x10] sm:$0xff]  ;;  %s226_s28 = smov [#allocation5]   ;;  %s149_s8 = sshll.u32 %s316_s7, 4  ;;  %vm140_vm2 = vcmask 64512   ;;  %s150_s8 = int_to_ptr.hbm [resolvable:$true] %s149_s8 }
   0x8   :  { %99 = vmatpush.msra.mxu1 %v78_v3  ;;  %v76_v5 = vld [vmem:[%s312_s3 + $0x8] sm:$0xff]  ;;  %v75_v6 = vld [vmem:[%s312_s3] sm:$0xff]  ;;  %v111_v7 = vld [vmem:[%s314_s5 + $0x18] sm:$0xff]  ;;  %s147_s29 = sshll.u32 %s226_s28, 4  ;;  %s148_s29 = int_to_ptr.vmem [resolvable:$true] %s147_s29 }
   0x9   :  { %69 = vmatpush.msra.mxu0 %v44_v1  ;;  %131 = vmatpush.msra.mxu2 %v111_v7  ;;  %v166_v8 = vld [vmem:[%s311_s2] ss:$0 sm:$0xff]  ;;  %v110_v12 = vld [vmem:[%s314_s5 + $0x10] sm:$0xff]  ;;  %v109_v13 = vld [vmem:[%s314_s5 + $0x8] sm:$0xff] }
   0xa   :  { %159 = vmatmul.msk.f32.vlgmr.msra.gmra.mxu0 %vm50_vm0, %v43_v2  ;;  %100 = vmatpush.msra.mxu1 %v77_v4  ;;  %v108_v14 = vld [vmem:[%s314_s5] sm:$0xff] }
   0xb   :  { %132 = vmatpush.msra.mxu2 %v110_v12  ;;  %v167_v15 = vld [vmem:[%s313_s4] ss:$0 sm:$0xff] }
   0xc   :  { %101 = vmatpush.msra.mxu1 %v76_v5  ;;  %v168_v19 = vld [vmem:[%s315_s6] ss:$0 sm:$0xff] }
   0xd   :  { %133 = vmatpush.msra.mxu2 %v109_v13 }
   0xe   :  { %102 = vmatpush.msra.mxu1 %v75_v6 }
   0xf   :  { %134 = vmatpush.msra.mxu2 %v108_v14 }
  0x87   :  { %v71_v9 = vpop.f32.mrf.mxu0 }
  0x88   :  { %v72_v10 = vadd.f32 %v166_v8, %v71_v9 }
  0x8a   :  { %v74_v11 = vmax.f32 %v72_v10, 0.0 }
  0x8c   :  { %160 = vmatmul.msk.f32.vlgmr.msra.gmra.mxu1 %vm83_vm1, %v74_v11 }
 0x109   :  { %v104_v16 = vpop.f32.mrf.mxu1 }
 0x10a   :  { %v105_v17 = vadd.f32 %v167_v15, %v104_v16 }
 0x10c   :  { %v107_v18 = vmax.f32 %v105_v17, 0.0 }
 0x10e   :  { %161 = vmatmul.msk.f32.vlgmr.msra.gmra.mxu2 %vm83_vm1, %v107_v18 }
 0x191   :  { %v136_v20 = vpop.f32.mrf.mxu2 }
 0x192   :  { %v137_v21 = vadd.f32 %v168_v19, %v136_v20 }
 0x194   :  { %169 = vtanh.f32 %v137_v21 }
 0x19a   :  { %v170_v22 = vpop.eup %169 }
 0x19b   :  { %141 = vst.msk [vmem:[#allocation5] sm:$0xff] %vm140_vm2, %v170_v22 }
 0x19c   :  { %152 = dma.vmem_to_hbm [thread:$0]  %s148_s29, 128, %s150_s8, [#allocation4]  }
 0x19d   :  { %221 = dma.done.wait [#allocation4], 128  }
 0x19e   :  { %222 = vsyncadd [#allocation4], 4294967168 }
 0x19f   :  { %157 = vsyncpa [#allocation3], 1 }
 0x1a0   :  { %158 = vsyncpa [#allocation4], 1 }

</bundles_post_ra>
